<compile_context>
chip_gen: v5e
topology: v5e:2x2
jax: 0.10.0
libtpu: 0.0.40
codegen_flags: <defaults>
</compile_context>

<pallas_src>
import functools

import jax
import jax.numpy as jnp
import numpy as np
from jax.experimental import pallas as pl
from jax.experimental.pallas import tpu as pltpu


def _round_up(x, m):
    return (x + m - 1) // m * m


def _ce_surv_kernel(*refs, alpha, eps, n_valid, has_s, needs_mask):
    """refs = (hz_ref, [s_ref,] y_ref, c_ref, out_ref, acc_ref).

    hz_ref/s_ref: (K, TB) f32, y_ref: (1, TB) i32, c_ref: (1, TB) f32,
    out_ref: (1,) f32 in SMEM, acc_ref: (1,) f32 SMEM scratch accumulator.
    alpha/eps are Python floats, n_valid the true batch size (Python int),
    needs_mask is a Python bool (True only when the batch was lane-padded).
    """
    if has_s:
        hz_ref, s_ref, y_ref, c_ref, out_ref, acc_ref = refs
    else:
        hz_ref, y_ref, c_ref, out_ref, acc_ref = refs

    pid = pl.program_id(0)

    @pl.when(pid == 0)
    def _():
        acc_ref[0] = 0.0

    hz = hz_ref[...]                         # (K, TB)
    y = y_ref[...]                           # (1, TB) int32
    c = c_ref[...]                           # (1, TB) float32
    K, TB = hz.shape

    # Per-bin rows (static unroll over small K).
    rows_hz = [hz[k:k + 1, :] for k in range(K)]
    if has_s:
        s = s_ref[...]
        rows_s = [s[k:k + 1, :] for k in range(K)]
    else:
        # S = cumprod(1 - hazards) computed in-kernel (no extra HBM input).
        rows_s = []
        prod = jnp.ones_like(rows_hz[0])
        for k in range(K):
            prod = prod * (1.0 - rows_hz[k])
            rows_s.append(prod)

    # gather(hazards, 1, Y) / gather(S, 1, Y) via unrolled select chains.
    h_y = rows_hz[0]
    s_y = rows_s[0]
    for k in range(1, K):
        sel = y == k
        h_y = jnp.where(sel, rows_hz[k], h_y)
        s_y = jnp.where(sel, rows_s[k], s_y)

    # gather(S_padded, 1, Y) with S_padded = cat([1, S], 1):
    #   1.0 if Y == 0 else S[:, Y-1]
    s_pad_y = jnp.ones_like(s_y)
    for k in range(1, K):
        s_pad_y = jnp.where(y == k, rows_s[k - 1], s_pad_y)

    one = jnp.float32(1.0)
    # Fused logs: log(a) + log(b) -> log(a*b)  (3 logs/element instead of 4).
    reg = -(one - c) * jnp.log((s_pad_y + eps) * jnp.maximum(h_y, eps))
    s_y_cl = jnp.maximum(s_y, eps)
    ce_l = -c * jnp.log(s_y_cl) - (one - c) * jnp.log(one - s_y_cl)
    loss = (one - alpha) * ce_l + alpha * reg            # (1, TB)

    if needs_mask:
        # Zero out padded batch entries (only emitted when padding exists).
        col = jax.lax.broadcasted_iota(jnp.int32, (1, TB), 1) + pid * TB
        loss = jnp.where(col < n_valid, loss, jnp.zeros_like(loss))

    acc_ref[0] += jnp.sum(loss)

    @pl.when(pid == pl.num_programs(0) - 1)
    def _():
        out_ref[0] = acc_ref[0] * (1.0 / float(n_valid))


def cross_entropy_surv_loss(hazards, S, Y, c, alpha=0.15, eps=1e-7,
                            max_tile=4096):
    """JAX/Pallas equivalent of CrossEntropySurvLoss.forward (ce_loss).

    hazards: (B, K) f32, S: (B, K) f32 or None, Y: (B,) int, c: (B,) f32/int.
    Returns scalar f32 loss.
    """
    hazards = jnp.asarray(hazards, jnp.float32)
    B, K = hazards.shape
    has_s = S is not None

    # Lane-dense layout: batch on the lane axis, padded to a multiple of the
    # batch tile (tile is a multiple of 128 lanes, up to max_tile).
    tb = min(max_tile, _round_up(B, 128))
    b_pad = _round_up(B, tb)
    pad = b_pad - B
    grid = (b_pad // tb,)

    def _pad_lanes(x):
        return jnp.pad(x, ((0, 0), (0, pad))) if pad else x

    hz_t = _pad_lanes(hazards.T)                                   # (K, B_pad)
    y_row = _pad_lanes(jnp.asarray(Y, jnp.int32).reshape(1, B))    # (1, B_pad)
    c_row = _pad_lanes(jnp.asarray(c, jnp.float32).reshape(1, B))  # (1, B_pad)

    kernel = functools.partial(
        _ce_surv_kernel,
        alpha=float(alpha), eps=float(eps), n_valid=int(B), has_s=has_s,
        needs_mask=bool(pad))

    in_specs = [pl.BlockSpec((K, tb), lambda i: (0, i))]
    args = [hz_t]
    if has_s:
        s_t = _pad_lanes(jnp.asarray(S, jnp.float32).T)
        in_specs.append(pl.BlockSpec((K, tb), lambda i: (0, i)))
        args.append(s_t)
    in_specs += [pl.BlockSpec((1, tb), lambda i: (0, i)),
                 pl.BlockSpec((1, tb), lambda i: (0, i))]
    args += [y_row, c_row]

    out = pl.pallas_call(
        kernel,
        out_shape=jax.ShapeDtypeStruct((1,), jnp.float32),
        grid_spec=pltpu.PrefetchScalarGridSpec(
            num_scalar_prefetch=0,
            grid=grid,
            in_specs=in_specs,
            out_specs=pl.BlockSpec(memory_space=pltpu.SMEM),
            scratch_shapes=[pltpu.SMEM((1,), jnp.float32)]),
        compiler_params=pltpu.CompilerParams(
            dimension_semantics=("arbitrary",)),
    )(*args)
    return out[0]


def _reference_loss(hazards, S, Y, c, alpha=0.15, eps=1e-7):
    """Pure-JAX reference mirroring torch ce_loss (for correctness checks)."""
    B = Y.shape[0]
    Y = Y.reshape(B, 1)
    c = c.reshape(B, 1).astype(jnp.float32)
    if S is None:
        S = jnp.cumprod(1.0 - hazards, axis=1)
    S_padded = jnp.concatenate([jnp.ones_like(c), S], axis=1)
    gather = lambda a, idx: jnp.take_along_axis(a, idx, axis=1)
    reg = -(1 - c) * (jnp.log(gather(S_padded, Y) + eps)
                      + jnp.log(jnp.maximum(gather(hazards, Y), eps)))
    s_y = jnp.maximum(gather(S, Y), eps)
    ce_l = -c * jnp.log(s_y) - (1 - c) * jnp.log(1 - s_y)
    return jnp.mean((1 - alpha) * ce_l + alpha * reg)


if __name__ == "__main__":
    key = jax.random.PRNGKey(0)
    B, K = 2, 4          # batch of 2, 4 discrete survival bins
    alpha = 0.15

    k1, k2, k3 = jax.random.split(key, 3)
    # hazards in (0, 1), like sigmoid outputs of the survival head
    hazards = jax.nn.sigmoid(jax.random.normal(k1, (B, K), dtype=jnp.float32))
    S = jnp.cumprod(1.0 - hazards, axis=1)                    # outputs.surv
    Y = jax.random.randint(k2, (B,), 0, K, dtype=jnp.int32)   # data['surv_label']
    c = jax.random.bernoulli(k3, 0.3, (B,)).astype(jnp.float32)  # data['c']

    # Path 1: S provided (matches CrossEntropySurvLoss.forward with outputs.surv)
    loss = cross_entropy_surv_loss(hazards, S, Y, c, alpha=alpha)
    loss = jax.block_until_ready(loss)
    ref = _reference_loss(hazards, S, Y, c, alpha=alpha)
    np.testing.assert_allclose(np.asarray(loss), np.asarray(ref),
                               rtol=1e-5, atol=1e-5)

    # Path 2: S is None -> cumprod fused inside the kernel
    loss_ns = cross_entropy_surv_loss(hazards, None, Y, c, alpha=alpha)
    loss_ns = jax.block_until_ready(loss_ns)
    ref_ns = _reference_loss(hazards, None, Y, c, alpha=alpha)
    np.testing.assert_allclose(np.asarray(loss_ns), np.asarray(ref_ns),
                               rtol=1e-5, atol=1e-5)

    print("KERNEL_OK")
</pallas_src>

<mosaic_0001>
module attributes {stable_mosaic.version = 11 : i64} {
  func.func @_ce_surv_kernel(%arg0: i32, %arg1: memref<4x128xf32, #tpu.memory_space<vmem>>, %arg2: memref<4x128xf32, #tpu.memory_space<vmem>>, %arg3: memref<1x128xi32, #tpu.memory_space<vmem>>, %arg4: memref<1x128xf32, #tpu.memory_space<vmem>>, %arg5: memref<1xf32, #tpu.memory_space<smem>>, %arg6: memref<1xf32, #tpu.memory_space<smem>>) attributes {dimension_semantics = [#tpu.dimension_semantics<arbitrary>], iteration_bounds = array<i64: 1>, scalar_prefetch = 0 : i64, scratch_operands = 1 : i64, tpu.core_type = #tpu.core_type<tc>, window_params = [{transform_indices = @transform_0, window_bounds = array<i64: 4, 128>}, {transform_indices = @transform_1, window_bounds = array<i64: 4, 128>}, {transform_indices = @transform_2, window_bounds = array<i64: 1, 128>}, {transform_indices = @transform_3, window_bounds = array<i64: 1, 128>}, {transform_indices = @transform_4, window_bounds = array<i64: 1>}]} {
    %c0_i32 = arith.constant 0 : i32
    %0 = arith.cmpi eq, %arg0, %c0_i32 : i32
    %1 = arith.extui %0 : i1 to i32
    %c0_i32_0 = arith.constant 0 : i32
    %2 = arith.cmpi ne, %1, %c0_i32_0 : i32
    scf.if %2 {
      %cst_29 = arith.constant 0.000000e+00 : f32
      %c0_30 = arith.constant 0 : index
      %85 = memref.load %arg6[%c0_30] : memref<1xf32, #tpu.memory_space<smem>>
      memref.store %cst_29, %arg6[%c0_30] : memref<1xf32, #tpu.memory_space<smem>>
    } else {
    }
    %c0 = arith.constant 0 : index
    %c0_1 = arith.constant 0 : index
    %3 = vector.load %arg1[%c0, %c0_1] : memref<4x128xf32, #tpu.memory_space<vmem>>, vector<4x128xf32>
    %c0_2 = arith.constant 0 : index
    %c0_3 = arith.constant 0 : index
    %4 = vector.load %arg3[%c0_2, %c0_3] : memref<1x128xi32, #tpu.memory_space<vmem>>, vector<1x128xi32>
    %c0_4 = arith.constant 0 : index
    %c0_5 = arith.constant 0 : index
    %5 = vector.load %arg4[%c0_4, %c0_5] : memref<1x128xf32, #tpu.memory_space<vmem>>, vector<1x128xf32>
    %6 = vector.extract_strided_slice %3 {offsets = [0, 0], sizes = [1, 128], strides = [1, 1]} : vector<4x128xf32> to vector<1x128xf32>
    %7 = vector.extract_strided_slice %3 {offsets = [1, 0], sizes = [1, 128], strides = [1, 1]} : vector<4x128xf32> to vector<1x128xf32>
    %8 = vector.extract_strided_slice %3 {offsets = [2, 0], sizes = [1, 128], strides = [1, 1]} : vector<4x128xf32> to vector<1x128xf32>
    %9 = vector.extract_strided_slice %3 {offsets = [3, 0], sizes = [1, 128], strides = [1, 1]} : vector<4x128xf32> to vector<1x128xf32>
    %c0_6 = arith.constant 0 : index
    %c0_7 = arith.constant 0 : index
    %10 = vector.load %arg2[%c0_6, %c0_7] : memref<4x128xf32, #tpu.memory_space<vmem>>, vector<4x128xf32>
    %11 = vector.extract_strided_slice %10 {offsets = [0, 0], sizes = [1, 128], strides = [1, 1]} : vector<4x128xf32> to vector<1x128xf32>
    %12 = vector.extract_strided_slice %10 {offsets = [1, 0], sizes = [1, 128], strides = [1, 1]} : vector<4x128xf32> to vector<1x128xf32>
    %13 = vector.extract_strided_slice %10 {offsets = [2, 0], sizes = [1, 128], strides = [1, 1]} : vector<4x128xf32> to vector<1x128xf32>
    %14 = vector.extract_strided_slice %10 {offsets = [3, 0], sizes = [1, 128], strides = [1, 1]} : vector<4x128xf32> to vector<1x128xf32>
    %c1_i32 = arith.constant 1 : i32
    %15 = vector.broadcast %c1_i32 : i32 to vector<1x128xi32>
    %16 = arith.cmpi eq, %4, %15 : vector<1x128xi32>
    %17 = arith.select %16, %7, %6 : vector<1x128xi1>, vector<1x128xf32>
    %18 = arith.select %16, %12, %11 : vector<1x128xi1>, vector<1x128xf32>
    %c2_i32 = arith.constant 2 : i32
    %19 = vector.broadcast %c2_i32 : i32 to vector<1x128xi32>
    %20 = arith.cmpi eq, %4, %19 : vector<1x128xi32>
    %21 = arith.select %20, %8, %17 : vector<1x128xi1>, vector<1x128xf32>
    %22 = arith.select %20, %13, %18 : vector<1x128xi1>, vector<1x128xf32>
    %c3_i32 = arith.constant 3 : i32
    %23 = vector.broadcast %c3_i32 : i32 to vector<1x128xi32>
    %24 = arith.cmpi eq, %4, %23 : vector<1x128xi32>
    %25 = arith.select %24, %9, %21 : vector<1x128xi1>, vector<1x128xf32>
    %26 = arith.select %24, %14, %22 : vector<1x128xi1>, vector<1x128xf32>
    %cst = arith.constant 1.000000e+00 : f32
    %27 = vector.broadcast %cst : f32 to vector<1x128xf32>
    %c1_i32_8 = arith.constant 1 : i32
    %28 = vector.broadcast %c1_i32_8 : i32 to vector<1x128xi32>
    %29 = arith.cmpi eq, %4, %28 : vector<1x128xi32>
    %30 = arith.select %29, %11, %27 : vector<1x128xi1>, vector<1x128xf32>
    %c2_i32_9 = arith.constant 2 : i32
    %31 = vector.broadcast %c2_i32_9 : i32 to vector<1x128xi32>
    %32 = arith.cmpi eq, %4, %31 : vector<1x128xi32>
    %33 = arith.select %32, %12, %30 : vector<1x128xi1>, vector<1x128xf32>
    %c3_i32_10 = arith.constant 3 : i32
    %34 = vector.broadcast %c3_i32_10 : i32 to vector<1x128xi32>
    %35 = arith.cmpi eq, %4, %34 : vector<1x128xi32>
    %36 = arith.select %35, %13, %33 : vector<1x128xi1>, vector<1x128xf32>
    %cst_11 = arith.constant 1.000000e+00 : f32
    %37 = vector.broadcast %cst_11 : f32 to vector<1x128xf32>
    %38 = arith.subf %37, %5 : vector<1x128xf32>
    %cst_12 = arith.constant 0.000000e+00 : f32
    %39 = vector.broadcast %cst_12 : f32 to vector<1x128xf32>
    %40 = arith.subf %39, %38 : vector<1x128xf32>
    %cst_13 = arith.constant 1.000000e-07 : f32
    %41 = vector.broadcast %cst_13 : f32 to vector<1x128xf32>
    %42 = arith.addf %36, %41 : vector<1x128xf32>
    %cst_14 = arith.constant 1.000000e-07 : f32
    %43 = vector.broadcast %cst_14 : f32 to vector<1x128xf32>
    %44 = arith.maximumf %25, %43 : vector<1x128xf32>
    %45 = arith.mulf %42, %44 : vector<1x128xf32>
    %46 = math.log %45 : vector<1x128xf32>
    %47 = arith.mulf %40, %46 : vector<1x128xf32>
    %cst_15 = arith.constant 1.000000e-07 : f32
    %48 = vector.broadcast %cst_15 : f32 to vector<1x128xf32>
    %49 = arith.maximumf %26, %48 : vector<1x128xf32>
    %cst_16 = arith.constant 0.000000e+00 : f32
    %50 = vector.broadcast %cst_16 : f32 to vector<1x128xf32>
    %51 = arith.subf %50, %5 : vector<1x128xf32>
    %52 = math.log %49 : vector<1x128xf32>
    %53 = arith.mulf %51, %52 : vector<1x128xf32>
    %cst_17 = arith.constant 1.000000e+00 : f32
    %54 = vector.broadcast %cst_17 : f32 to vector<1x128xf32>
    %55 = arith.subf %54, %5 : vector<1x128xf32>
    %cst_18 = arith.constant 1.000000e+00 : f32
    %56 = vector.broadcast %cst_18 : f32 to vector<1x128xf32>
    %57 = arith.subf %56, %49 : vector<1x128xf32>
    %58 = math.log %57 : vector<1x128xf32>
    %59 = arith.mulf %55, %58 : vector<1x128xf32>
    %60 = arith.subf %53, %59 : vector<1x128xf32>
    %cst_19 = arith.constant 1.000000e+00 : f32
    %cst_20 = arith.constant 1.500000e-01 : f32
    %61 = arith.subf %cst_19, %cst_20 : f32
    %62 = vector.broadcast %61 : f32 to vector<1x128xf32>
    %63 = arith.mulf %62, %60 : vector<1x128xf32>
    %cst_21 = arith.constant 1.500000e-01 : f32
    %64 = vector.broadcast %cst_21 : f32 to vector<1x128xf32>
    %65 = arith.mulf %64, %47 : vector<1x128xf32>
    %66 = arith.addf %63, %65 : vector<1x128xf32>
    %67 = tpu.iota {dimensions = array<i32: 1>} : vector<1x128xi32>
    %c128_i32 = arith.constant 128 : i32
    %68 = arith.muli %arg0, %c128_i32 : i32
    %69 = vector.broadcast %68 : i32 to vector<1x128xi32>
    %70 = arith.addi %67, %69 : vector<1x128xi32>
    %c2_i32_22 = arith.constant 2 : i32
    %71 = vector.broadcast %c2_i32_22 : i32 to vector<1x128xi32>
    %72 = arith.cmpi slt, %70, %71 : vector<1x128xi32>
    %cst_23 = arith.constant 0.000000e+00 : f32
    %73 = vector.broadcast %cst_23 : f32 to vector<1x128xf32>
    %74 = arith.select %72, %66, %73 : vector<1x128xi1>, vector<1x128xf32>
    %c0_24 = arith.constant 0 : index
    %75 = memref.load %arg6[%c0_24] : memref<1xf32, #tpu.memory_space<smem>>
    %76 = vector.shape_cast %74 : vector<1x128xf32> to vector<1x1x128xf32>
    %cst_25 = arith.constant dense<0.000000e+00> : vector<1xf32>
    %77 = vector.multi_reduction <add>, %76, %cst_25 [1, 2] : vector<1x1x128xf32> to vector<1xf32>
    %78 = vector.shape_cast %77 : vector<1xf32> to vector<1x1x1xf32>
    %79 = vector.extract %78[0, 0, 0] : f32 from vector<1x1x1xf32>
    %80 = arith.addf %75, %79 : f32
    %c0_26 = arith.constant 0 : index
    %81 = memref.load %arg6[%c0_26] : memref<1xf32, #tpu.memory_space<smem>>
    memref.store %80, %arg6[%c0_26] : memref<1xf32, #tpu.memory_space<smem>>
    %c0_i32_27 = arith.constant 0 : i32
    %82 = arith.cmpi eq, %arg0, %c0_i32_27 : i32
    %83 = arith.extui %82 : i1 to i32
    %c0_i32_28 = arith.constant 0 : i32
    %84 = arith.cmpi ne, %83, %c0_i32_28 : i32
    scf.if %84 {
      %c0_29 = arith.constant 0 : index
      %85 = memref.load %arg6[%c0_29] : memref<1xf32, #tpu.memory_space<smem>>
      %cst_30 = arith.constant 5.000000e-01 : f32
      %86 = arith.mulf %85, %cst_30 : f32
      %c0_31 = arith.constant 0 : index
      %87 = memref.load %arg5[%c0_31] : memref<1xf32, #tpu.memory_space<smem>>
      memref.store %86, %arg5[%c0_31] : memref<1xf32, #tpu.memory_space<smem>>
    } else {
    }
    return
  }
  func.func @transform_0(%arg0: i32) -> (i32, i32) {
    %c0_i32 = arith.constant 0 : i32
    %c0_i32_0 = arith.constant 0 : i32
    return %c0_i32, %arg0 : i32, i32
  }
  func.func @transform_1(%arg0: i32) -> (i32, i32) {
    %c0_i32 = arith.constant 0 : i32
    %c0_i32_0 = arith.constant 0 : i32
    return %c0_i32, %arg0 : i32, i32
  }
  func.func @transform_2(%arg0: i32) -> (i32, i32) {
    %c0_i32 = arith.constant 0 : i32
    %c0_i32_0 = arith.constant 0 : i32
    return %c0_i32, %arg0 : i32, i32
  }
  func.func @transform_3(%arg0: i32) -> (i32, i32) {
    %c0_i32 = arith.constant 0 : i32
    %c0_i32_0 = arith.constant 0 : i32
    return %c0_i32, %arg0 : i32, i32
  }
  func.func @transform_4(%arg0: i32) -> i32 {
    %c0_i32 = arith.constant 0 : i32
    %c0_i32_0 = arith.constant 0 : i32
    return %c0_i32 : i32
  }
}

</mosaic_0001>

<bundles_post_ra>
// kernel: tpu_custom_call.1
= control target key start
LH: loop header
LB: loop body
LE: loop exit
PB: predicated region body
PF: predicated region fallthrough
CT: control target
= control target key end

     0   :  { %9 = vsyncpa [#allocation4], 0  ;;  %s298_s0 = inlined_call_operand.hbm [shape: f32[4,128], index: 0, kind: input, shape index: {}]   ;;  %s299_s1 = inlined_call_operand.hbm [shape: f32[4,128], index: 1, kind: input, shape index: {}]   ;;  %s300_s2 = inlined_call_operand.vmem [shape: s32[1,128], index: 2, kind: input, shape index: {}]   ;;  %s301_s3 = inlined_call_operand.vmem [shape: f32[1,128], index: 3, kind: input, shape index: {}]   ;;  %s302_s4 = inlined_call_operand.hbm [shape: f32[1], index: 4, kind: output, shape index: {}]  }
   0x1   :  { %10 = vsyncpa [#allocation7], 0 }
   0x2   :  { %11 = vsyncpa [#allocation5], 0  ;;  %s17_s17 = sshll.u32 %s298_s0, 4  ;;  %s246_s18 = smov [#allocation3]   ;;  %s18_s17 = int_to_ptr.hbm [resolvable:$true] %s17_s17 }
   0x3   :  { %s19_s19 = sshll.u32 %s246_s18, 4  ;;  %s28_s22 = sshll.u32 %s299_s1, 4  ;;  %s20_s19 = int_to_ptr.vmem [resolvable:$true] %s19_s19  ;;  %s29_s22 = int_to_ptr.hbm [resolvable:$true] %s28_s22 }
   0x4   :  { %22 = dma.hbm_to_vmem [thread:$0]  %s18_s17, 64, %s20_s19, [#allocation4]  }
   0x5   :  { %s247_s23 = smov [#allocation6]  }
   0x6   :  { %s30_s24 = sshll.u32 %s247_s23, 4  ;;  %s31_s24 = int_to_ptr.vmem [resolvable:$true] %s30_s24 }
   0x7   :  { %33 = dma.hbm_to_vmem [thread:$0]  %s29_s22, 64, %s31_s24, [#allocation7]  }
   0x8   :  { %240 = dma.done.wait [#allocation4], 64  }
   0x9   :  { %241 = vsyncadd [#allocation4], 4294967232 }
   0xa   :  { %242 = dma.done.wait [#allocation7], 64  }
   0xb   :  { %243 = vsyncadd [#allocation7], 4294967232  ;;  %v52_v0 = vld [vmem:[#allocation3] sm:$0xf]  ;;  %v55_v1 = vld [vmem:[#allocation6] sm:$0xf]  ;;  %v123_v34 = vlaneseq }
   0xc   :  { %58 = vst [vmem:[#allocation1] sm:$0xff] %v52_v0  ;;  %v53_v6 = vld [vmem:[%s300_s2] sm:$0x1]  ;;  %vm131_vm4 = vcmask 1040384   ;;  %s157_s27 = sshll.u32 %s302_s4, 4  ;;  %s248_s30 = smov [#allocation8]   ;;  %s158_s27 = int_to_ptr.hbm [resolvable:$true] %s157_s27 }
   0xd   :  { %vm56_vm0 = vcmp.eq.s32.totalorder %v53_v6, 1  ;;  %vm69_vm1 = vcmp.eq.s32.totalorder %v53_v6, 2  ;;  %vm80_vm2 = vcmp.eq.s32.totalorder %v53_v6, 3  ;;  %v54_v22 = vld [vmem:[%s301_s3] sm:$0x1]  ;;  %v124_v39 = vand.u32 127, %v123_v34 }
   0xe   :  { %v91_v17 = vsel %vm56_vm0, %v55_v1, 1.0  ;;  %v102_v27 = vsub.f32 1.0, %v54_v22  ;;  %v111_v28 = vsub.f32 0.0, %v54_v22 }
   0xf   :  { %vm128_vm3 = vcmp.lt.s32.totalorder %v124_v39, 2 }
  0x10   :  { %v103_v35 = vsub.f32 0.0, %v102_v27 }
  0x13   :  { %v60_v2 = vld [vmem:[#allocation1 + $0x1] ss:$9 sm:$0xff] }
  0x14   :  { %64 = vst [vmem:[#allocation1] sm:$0xff] %v55_v1  ;;  %v62_v14 = vsel %vm56_vm0, %v60_v2, %v52_v0 }
  0x1b   :  { %v66_v3 = vld [vmem:[#allocation1 + $0x1] ss:$9 sm:$0xff] }
  0x1c   :  { %70 = vst [vmem:[#allocation1] sm:$0xff] %v52_v0  ;;  %v68_v8 = vsel %vm56_vm0, %v66_v3, %v55_v1 }
  0x23   :  { %v72_v4 = vld [vmem:[#allocation1 + $0x2] ss:$9 sm:$0xff] }
  0x24   :  { %75 = vst [vmem:[#allocation1] sm:$0xff] %v55_v1  ;;  %v74_v16 = vsel %vm69_vm1, %v72_v4, %v62_v14 }
  0x2b   :  { %v77_v5 = vld [vmem:[#allocation1 + $0x2] ss:$9 sm:$0xff] }
  0x2c   :  { %81 = vst [vmem:[#allocation1] sm:$0xff] %v52_v0  ;;  %v79_v9 = vsel %vm69_vm1, %v77_v5, %v68_v8 }
  0x33   :  { %v83_v7 = vld [vmem:[#allocation1 + $0x3] ss:$9 sm:$0xff] }
  0x34   :  { %86 = vst [vmem:[#allocation1] sm:$0xff] %v55_v1  ;;  %v85_v18 = vsel %vm80_vm2, %v83_v7, %v74_v16 }
  0x35   :  { %v105_v24 = vmax.f32 %v85_v18, 1e-07 }
  0x3b   :  { %v88_v10 = vld [vmem:[#allocation1 + $0x3] ss:$9 sm:$0xff] }
  0x3c   :  { %v90_v11 = vsel %vm80_vm2, %v88_v10, %v79_v9  ;;  %92 = vst [vmem:[#allocation1] sm:$0xff] %v55_v1 }
  0x3d   :  { %v110_v12 = vmax.f32 %v90_v11, 1e-07 }
  0x3f   :  { %v115_v13 = vsub.f32 1.0, %v110_v12  ;;  %174 = vlog2.f32 %v110_v12 }
  0x41   :  { %176 = vlog2.f32 %v115_v13 }
  0x43   :  { %v94_v15 = vld [vmem:[#allocation1 + $0x1] ss:$9 sm:$0xff] }
  0x44   :  { %97 = vst [vmem:[#allocation1] sm:$0xff] %v55_v1  ;;  %v96_v19 = vsel %vm69_vm1, %v94_v15, %v91_v17 }
  0x45   :  { %v175_v20 = vpop.eup %174 }
  0x46   :  { %v113_v29 = vmul.f32 0.6931472, %v175_v20 }
  0x47   :  { %v177_v21 = vpop.eup %176 }
  0x48   :  { %v117_v30 = vmul.f32 0.6931472, %v177_v21  ;;  %v114_v32 = vmul.f32 %v113_v29, %v111_v28 }
  0x4a   :  { %v118_v33 = vmul.f32 %v117_v30, %v102_v27 }
  0x4b   :  { %v99_v23 = vld [vmem:[#allocation1 + $0x2] ss:$9 sm:$0xff] }
  0x4c   :  { %v101_v25 = vsel %vm80_vm2, %v99_v23, %v96_v19  ;;  %v119_v36 = vsub.f32 %v114_v32, %v118_v33 }
  0x4d   :  { %v104_v26 = vadd.f32 1e-07, %v101_v25 }
  0x4e   :  { %v120_v41 = vmul.f32 0.85, %v119_v36 }
  0x4f   :  { %v106_v31 = vmul.f32 %v105_v24, %v104_v26 }
  0x51   :  { %178 = vlog2.f32 %v106_v31 }
  0x57   :  { %v179_v37 = vpop.eup %178 }
  0x58   :  { %v108_v38 = vmul.f32 0.6931472, %v179_v37 }
  0x5a   :  { %v109_v40 = vmul.f32 %v108_v38, %v103_v35 }
  0x5c   :  { %v121_v42 = vmul.f32 0.15, %v109_v40 }
  0x5e   :  { %v122_v43 = vadd.f32 %v121_v42, %v120_v41 }
  0x60   :  { %v129_v44 = vsel %vm128_vm3, %v122_v43, 0.0 }
  0x61   :  { %v132_v45 = vsel %vm131_vm4, %v129_v44, 0.0 }
  0x62   :  { %133 = vadd.xlane.f32.xlu0 %v132_v45 }
  0xd5   :  { %v134_v46 = vpop.xlane.xlu0 %133 }
  0xd6   :  { %v135_v47 = vrot.slane %v134_v46, 4 }
  0xd8   :  { %v136_v48 = vadd.f32 %v135_v47, %v134_v46 }
  0xda   :  { %v137_v49 = vrot.slane %v136_v48, 2 }
  0xdc   :  { %v138_v50 = vadd.f32 %v137_v49, %v136_v48 }
  0xde   :  { %v139_v51 = vrot.slane %v138_v50, 1 }
  0xe0   :  { %v140_v52 = vadd.f32 %v139_v51, %v138_v50 }
  0xe2   :  { %169 = vpush %v140_v52 }
 0x113   :  { %s170_s28 = spop %169 }
 0x114   :  { %s149_s29 = smul.f32 0.5, %s170_s28 }
 0x116   :  { %151 = sst [smem:[#allocation8]] %s149_s29 }
 0x117   :  { %160 = dma.smem_to_hbm %s248_s30, 16, %s158_s27, [#allocation5]  }
 0x118   :  { %244 = dma.done.wait [#allocation5], 16  }
 0x119   :  { %245 = vsyncadd [#allocation5], 4294967280 }
 0x11a   :  { %165 = sfence }
 0x11b   :  { %166 = vsyncpa [#allocation4], 1 }
 0x11c   :  { %167 = vsyncpa [#allocation7], 1 }
 0x11d   :  { %168 = vsyncpa [#allocation5], 1 }

</bundles_post_ra>
